<compile_context>
chip_gen: v6e
topology: v6e:2x2x1
jax: 0.10.0
libtpu: 0.0.40
codegen_flags: <defaults>
</compile_context>

<pallas_src>
import functools

import jax
import jax.numpy as jnp
from jax.experimental import pallas as pl
from jax.experimental.pallas import tpu as pltpu


def _round_up(x, m):
    return ((x + m - 1) // m) * m


def _pick_tile(dim, cap, align):
    """Largest multiple of `align` that divides `dim` and is <= min(cap, dim).

    `dim` must be a multiple of `align`, so a valid tile always exists.
    """
    t = (min(cap, dim) // align) * align
    while dim % t != 0:
        t -= align
    return t


# ----------------------------------------------------------------------------
# Kernel bodies
# ----------------------------------------------------------------------------
def _heads_kernel_single(x_ref, w_ref, b_ref, o_ref, *, compute_dtype):
    # Whole contraction in one tile: dot + bias straight to the output block.
    acc = jnp.dot(
        x_ref[...].astype(compute_dtype),  # in-kernel bf16 cast (VPU is idle here)
        w_ref[...],
        preferred_element_type=jnp.float32,
    )
    o_ref[...] = (acc + b_ref[...]).astype(o_ref.dtype)


def _heads_kernel_multi(x_ref, w_ref, b_ref, o_ref, acc_ref, *, compute_dtype):
    kk = pl.program_id(2)

    @pl.when(kk == 0)
    def _():
        acc_ref[...] = jnp.zeros_like(acc_ref)

    acc_ref[...] += jnp.dot(
        x_ref[...].astype(compute_dtype),
        w_ref[...],
        preferred_element_type=jnp.float32,
    )

    @pl.when(kk == pl.num_programs(2) - 1)
    def _():
        o_ref[...] = (acc_ref[...] + b_ref[...]).astype(o_ref.dtype)


# ----------------------------------------------------------------------------
# One-time parameter preparation (weights are static module parameters)
# ----------------------------------------------------------------------------
def prepare_refinement_heads_params(w_stacked, b_stacked, *, compute_dtype=jnp.bfloat16):
    """Fuse the k heads into one wide, lane-padded, bf16 weight matrix ONCE.

    w_stacked: (k, D_in, D_out)  (so y_i = x @ w_stacked[i])
    b_stacked: (k, D_out)
    returns:   w_fused (D_in_pad, C_pad) compute_dtype,  b_fused (1, C_pad) f32
               where C = k*D_out, fused column = head * D_out + j.
    """
    k, d_in, d_out = w_stacked.shape
    c = k * d_out
    k_pad = _round_up(d_in, 128)   # contraction lanes
    c_pad = _round_up(c, 128)      # output lanes (unmasked vst)

    w_all = jnp.transpose(w_stacked, (1, 0, 2)).reshape(d_in, c)
    w_fused = jnp.pad(w_all, ((0, k_pad - d_in), (0, c_pad - c))).astype(compute_dtype)
    b_fused = jnp.pad(b_stacked.reshape(1, c).astype(jnp.float32),
                      ((0, 0), (0, c_pad - c)))
    return jax.device_put(w_fused), jax.device_put(b_fused)


# ----------------------------------------------------------------------------
# Forward pass
# ----------------------------------------------------------------------------
@functools.partial(jax.jit, static_argnames=("k", "d_out", "compute_dtype"))
def refinement_heads_pallas(x, w_fused, b_fused, *, k, d_out,
                            compute_dtype=jnp.bfloat16):
    """k fused Linear heads.  Returns (k, N, D_out) stacked head outputs."""
    n, d_in = x.shape
    k_pad, c_pad = w_fused.shape
    c = k * d_out
    out_dtype = x.dtype

    # rows: 16 for bf16 sublane packing (8 would half-fill packed sublanes)
    row_align = 16 if jnp.dtype(compute_dtype).itemsize < 4 else 8
    m_pad = _round_up(n, row_align)

    # x stays f32 in HBM; alignment-only zero pad (exact for the contraction).
    x_p = jnp.pad(x, ((0, m_pad - n), (0, k_pad - d_in)))

    # Tiles are divisors of the alignment-padded dims: zero pad-to-tile waste.
    tm = _pick_tile(m_pad, 256, row_align)
    tn = _pick_tile(c_pad, 512, 128)     # large streamed tiles help v5e/v6e
    tk = _pick_tile(k_pad, 1024, 128)

    # v7x has 2 TensorCores: if the row axis is a single block, try to give the
    # (parallel) column axis at least 2 blocks so both cores get work.
    if m_pad // tm == 1 and c_pad // tn < 2 and c_pad >= 256:
        tn = _pick_tile(c_pad, c_pad // 2, 128)

    m_blocks, c_blocks, k_blocks = m_pad // tm, c_pad // tn, k_pad // tk

    bytes_accessed = (
        m_pad * k_pad * x_p.dtype.itemsize                      # x (f32, read once)
        + k_pad * c_pad * jnp.dtype(compute_dtype).itemsize     # fused weights
        + c_pad * 4                                             # bias
        + m_pad * c_pad * jnp.dtype(out_dtype).itemsize         # output
    )
    cost = pl.CostEstimate(
        flops=2 * m_pad * k_pad * c_pad,
        transcendentals=0,
        bytes_accessed=bytes_accessed,
    )

    if k_blocks == 1:
        # Fast path: whole contraction in one tile (true for any D_in <= 1024).
        grid = (m_blocks, c_blocks)
        kernel = functools.partial(_heads_kernel_single, compute_dtype=compute_dtype)
        in_specs = [
            pl.BlockSpec((tm, tk), lambda i, j: (i, 0)),   # x tile
            pl.BlockSpec((tk, tn), lambda i, j: (0, j)),   # fused W tile
            pl.BlockSpec((1, tn), lambda i, j: (0, j)),    # fused bias tile
        ]
        out_specs = pl.BlockSpec((tm, tn), lambda i, j: (i, j))
        scratch_shapes = []
        dim_sem = ("parallel", "parallel")
    else:
        grid = (m_blocks, c_blocks, k_blocks)
        kernel = functools.partial(_heads_kernel_multi, compute_dtype=compute_dtype)
        in_specs = [
            pl.BlockSpec((tm, tk), lambda i, j, l: (i, l)),
            pl.BlockSpec((tk, tn), lambda i, j, l: (l, j)),
            pl.BlockSpec((1, tn), lambda i, j, l: (0, j)),
        ]
        out_specs = pl.BlockSpec((tm, tn), lambda i, j, l: (i, j))
        scratch_shapes = [pltpu.VMEM((tm, tn), jnp.float32)]
        dim_sem = ("parallel", "parallel", "arbitrary")

    out = pl.pallas_call(
        kernel,
        out_shape=jax.ShapeDtypeStruct((m_pad, c_pad), out_dtype),
        grid_spec=pltpu.PrefetchScalarGridSpec(
            num_scalar_prefetch=0,
            grid=grid,
            in_specs=in_specs,
            out_specs=out_specs,
            scratch_shapes=scratch_shapes,
        ),
        compiler_params=pltpu.CompilerParams(
            dimension_semantics=dim_sem,
            vmem_limit_bytes=32 * 1024 * 1024,   # explicit: safe on v7x (64 MiB phys)
        ),
        cost_estimate=cost,
    )(x_p, w_fused, b_fused)

    # strip padding and un-fuse back to (k, N, D_out)
    out = out[:n, :c].reshape(n, k, d_out)
    return jnp.transpose(out, (1, 0, 2))


def make_params(key, in_features, out_features, k):
    """Deterministic nn.Linear-style init: U(-1/sqrt(fan_in), 1/sqrt(fan_in))."""
    bound = 1.0 / (in_features ** 0.5)
    keys = jax.random.split(key, 2 * k)
    ws, bs = [], []
    for i in range(k):
        # PyTorch stores (out, in); we keep (in, out) so the kernel does x @ W
        # directly (identical math to x @ W_pt^T).
        w = jax.random.uniform(
            keys[2 * i], (in_features, out_features),
            minval=-bound, maxval=bound, dtype=jnp.float32)
        b = jax.random.uniform(
            keys[2 * i + 1], (out_features,),
            minval=-bound, maxval=bound, dtype=jnp.float32)
        ws.append(w)
        bs.append(b)
    return jnp.stack(ws, axis=0), jnp.stack(bs, axis=0)


if __name__ == "__main__":
    K = 3
    N = 8             # number of proposals / rows
    IN_FEATURES = 32
    OUT_FEATURES = 16

    key = jax.random.PRNGKey(0)
    kx, kp = jax.random.split(key)
    x = jax.random.normal(kx, (N, IN_FEATURES), dtype=jnp.float32)
    w_stacked, b_stacked = make_params(kp, IN_FEATURES, OUT_FEATURES, K)

    # Fuse / cast / pad the weights ONCE (static parameters), reuse every call.
    w_fused, b_fused = prepare_refinement_heads_params(w_stacked, b_stacked)

    out = refinement_heads_pallas(x, w_fused, b_fused, k=K, d_out=OUT_FEATURES)
    out = jax.block_until_ready(out)

    # unstack to match the PyTorch return type (a list of k tensors)
    result = [out[i] for i in range(K)]

    # Reference 1: same precision as the kernel (bf16 operands, f32 accum).
    ref_bf16 = [
        jnp.dot(x.astype(jnp.bfloat16), w_stacked[i].astype(jnp.bfloat16),
                preferred_element_type=jnp.float32) + b_stacked[i][None, :]
        for i in range(K)
    ]
    # Reference 2: full f32 (loose tolerance to cover the bf16 operand cast).
    ref_f32 = [x @ w_stacked[i] + b_stacked[i][None, :] for i in range(K)]

    for got, want_b, want_f in zip(result, ref_bf16, ref_f32):
        assert got.shape == (N, OUT_FEATURES)
        assert jnp.allclose(got, want_b, atol=1e-3, rtol=1e-3)
        assert jnp.allclose(got, want_f, atol=5e-2, rtol=5e-2)

    print("KERNEL_OK")
</pallas_src>

<mosaic_0001>
module attributes {stable_mosaic.version = 11 : i64} {
  func.func @_heads_kernel_single(%arg0: i32, %arg1: i32, %arg2: memref<16x128xf32, #tpu.memory_space<vmem>>, %arg3: memref<128x128xbf16, #tpu.memory_space<vmem>>, %arg4: memref<1x128xf32, #tpu.memory_space<vmem>>, %arg5: memref<16x128xf32, #tpu.memory_space<vmem>>) attributes {dimension_semantics = [#tpu.dimension_semantics<parallel>, #tpu.dimension_semantics<parallel>], iteration_bounds = array<i64: 1, 1>, scalar_prefetch = 0 : i64, scratch_operands = 0 : i64, tpu.core_type = #tpu.core_type<tc>, window_params = [{transform_indices = @transform_0, window_bounds = array<i64: 16, 128>}, {transform_indices = @transform_1, window_bounds = array<i64: 128, 128>}, {transform_indices = @transform_2, window_bounds = array<i64: 1, 128>}, {transform_indices = @transform_3, window_bounds = array<i64: 16, 128>}]} {
    %c0 = arith.constant 0 : index
    %c0_0 = arith.constant 0 : index
    %0 = vector.load %arg2[%c0, %c0_0] : memref<16x128xf32, #tpu.memory_space<vmem>>, vector<16x128xf32>
    %1 = arith.truncf %0 : vector<16x128xf32> to vector<16x128xbf16>
    %c0_1 = arith.constant 0 : index
    %c0_2 = arith.constant 0 : index
    %2 = vector.load %arg3[%c0_1, %c0_2] : memref<128x128xbf16, #tpu.memory_space<vmem>>, vector<128x128xbf16>
    %cst = arith.constant dense<0.000000e+00> : vector<16x128xf32>
    %3 = tpu.matmul %1, %2, %cst {dimension_numbers = #tpu.dot_dimension_numbers<[1], [0], [0], [1], [0, 0, 1, 1], [], []>} : vector<16x128xbf16>, vector<128x128xbf16>, vector<16x128xf32> -> vector<16x128xf32>
    %c0_3 = arith.constant 0 : index
    %c0_4 = arith.constant 0 : index
    %4 = vector.load %arg4[%c0_3, %c0_4] : memref<1x128xf32, #tpu.memory_space<vmem>>, vector<1x128xf32>
    %5 = vector.broadcast %4 : vector<1x128xf32> to vector<16x128xf32>
    %6 = arith.addf %3, %5 : vector<16x128xf32>
    %c0_5 = arith.constant 0 : index
    %c0_6 = arith.constant 0 : index
    %7 = vector.load %arg5[%c0_5, %c0_6] : memref<16x128xf32, #tpu.memory_space<vmem>>, vector<16x128xf32>
    tpu.vector_store %arg5[%c0_5, %c0_6], %6 {strides = array<i32>} : memref<16x128xf32, #tpu.memory_space<vmem>>, vector<16x128xf32>,
    return
  }
  func.func @transform_0(%arg0: i32, %arg1: i32) -> (i32, i32) {
    %c0_i32 = arith.constant 0 : i32
    %c0_i32_0 = arith.constant 0 : i32
    return %arg0, %c0_i32 : i32, i32
  }
  func.func @transform_1(%arg0: i32, %arg1: i32) -> (i32, i32) {
    %c0_i32 = arith.constant 0 : i32
    %c0_i32_0 = arith.constant 0 : i32
    return %c0_i32, %arg1 : i32, i32
  }
  func.func @transform_2(%arg0: i32, %arg1: i32) -> (i32, i32) {
    %c0_i32 = arith.constant 0 : i32
    %c0_i32_0 = arith.constant 0 : i32
    return %c0_i32, %arg1 : i32, i32
  }
  func.func @transform_3(%arg0: i32, %arg1: i32) -> (i32, i32) {
    %c0_i32 = arith.constant 0 : i32
    return %arg0, %arg1 : i32, i32
  }
}

</mosaic_0001>

<bundles_post_ra>
// kernel: refinement_heads_pallas.1
= control target key start
LH: loop header
LB: loop body
LE: loop exit
PB: predicated region body
PF: predicated region fallthrough
CT: control target
= control target key end

     0   :  { %8 = vsyncpa [#allocation3], 0  ;;  %s224_s12 = smov [#allocation2]   ;;  %s267_s0 = inlined_call_operand.vmem [shape: f32[16,128], index: 0, kind: input, shape index: {}]   ;;  %s268_s1 = inlined_call_operand.hbm [shape: bf16[128,128], index: 1, kind: input, shape index: {}]   ;;  %s269_s2 = inlined_call_operand.vmem [shape: f32[1,128], index: 2, kind: input, shape index: {}]   ;;  %s270_s3 = inlined_call_operand.vmem [shape: f32[16,128], index: 3, kind: output, shape index: {}]  }
   0x1   :  { %s16_s13 = sshll.u32 %s224_s12, 4  ;;  %s17_s13 = int_to_ptr.vmem [resolvable:$true] %s16_s13 }
   0x2   :  { %s210_s14 = scalar_lea.vmem %s17_s13, 1024  ;;  %p215_p1 = scmp.lt.s32.totalorder %s17_s13, %s17_s13 }
   0x3   :  { %p211_p0 = scmp.ne.s32.totalorder %s17_s13, %s210_s14  ;;  %p216_p2 = scmp.lt.s32.totalorder %s210_s14, %s210_s14 }
   0x5   :  { %p217_p3 = por %p216_p2, %p215_p1 }
   0x7   :  { %p218_p4 = pnand %p217_p3, %p211_p0 }
   0x9   :  { %221 = shalt.err (!%p218_p4)
}
   0xa   :  { %s225_s15 = smov 64   ;;  %s226_s16 = smov 4  }
   0xb   :  { %22 = dma.hbm_to_vmem [thread:$0]  %s268_s1, 1024, %s17_s13, [#allocation3], %s225_s15, %s225_s15, %s226_s16  }
   0xc   :  { %222 = dma.done.wait [#allocation3], 1024  }
   0xd   :  { %223 = vsyncadd [#allocation3], 4294966272  ;;  %v227_v0 = vmov 0.0   ;;  %vm228_vm0 = vmmov 0   ;;  %v194_v1 = vld [vmem:[#allocation2 + $0x38] sm:$0xff]   ;;  %v195_v2 = vld [vmem:[#allocation2 + $0x30] sm:$0xff]  }
   0xe   :  { %169 = vmatprep.subr.bf16.mxu0 %v227_v0  ;;  %185 = vmatprep.mubr.msk.bf16.mxu0 %vm228_vm0, %v227_v0  ;;  %v196_v3 = vld [vmem:[#allocation2 + $0x28] sm:$0xff]   ;;  %v197_v4 = vld [vmem:[#allocation2 + $0x20] sm:$0xff]   ;;  %v198_v5 = vld [vmem:[#allocation2 + $0x18] sm:$0xff]  }
   0xf   :  { %170 = vmatpush3.bf16.msra.mxu0 %v194_v1  ;;  %v199_v6 = vld [vmem:[#allocation2 + $0x10] sm:$0xff]   ;;  %v200_v7 = vld [vmem:[#allocation2 + $0x8] sm:$0xff]   ;;  %v201_v8 = vld [vmem:[#allocation2] sm:$0xff]  }
  0x10   :  { %171 = vmatprep.subr.bf16.mxu0 %v227_v0  ;;  %v29_v9 = vld [vmem:[%s267_s0] sm:$0xff]  ;;  %v30_v10 = vld [vmem:[%s267_s0 + $0x8] sm:$0xff] }
  0x11   :  { %v31_v11 = vpack.c.bf16 %v30_v10, %v29_v9  ;;  %v151_v12 = vld [vmem:[%s269_s2] ss:$0 sm:$0xff] }
  0x13   :  { %172 = vmatpush3.bf16.msra.mxu0 %v195_v2 }
  0x14   :  { %173 = vmatprep.subr.bf16.mxu0 %v227_v0 }
  0x17   :  { %174 = vmatpush3.bf16.msra.mxu0 %v196_v3 }
  0x18   :  { %175 = vmatprep.subr.bf16.mxu0 %v227_v0 }
  0x1b   :  { %176 = vmatpush3.bf16.msra.mxu0 %v197_v4 }
  0x1c   :  { %177 = vmatprep.subr.bf16.mxu0 %v227_v0 }
  0x1f   :  { %178 = vmatpush3.bf16.msra.mxu0 %v198_v5 }
  0x20   :  { %179 = vmatprep.subr.bf16.mxu0 %v227_v0 }
  0x23   :  { %180 = vmatpush3.bf16.msra.mxu0 %v199_v6 }
  0x24   :  { %181 = vmatprep.subr.bf16.mxu0 %v227_v0 }
  0x27   :  { %182 = vmatpush3.bf16.msra.mxu0 %v200_v7 }
  0x28   :  { %183 = vmatprep.subr.bf16.mxu0 %v227_v0 }
  0x2b   :  { %184 = vmatpush3.bf16.msra.mxu0 %v201_v8 }
  0x2e   :  { %186 = vmatmul.mubr.bf16.vlgmr.msra.gmra.mxu0 %v31_v11 }
  0xee   :  { %v137_v13 = vpop.f32.mrf.mxu0 }
  0xef   :  { %v138_v14 = vadd.f32 %v151_v12, %v137_v13 }
  0xf0   :  { %v187_v15 = vpop.f32.mrf.mxu0 }
  0xf1   :  { %144 = vst [vmem:[%s270_s3] sm:$0xff] %v138_v14 }
  0xf2   :  { %v140_v16 = vpop.f32.mrf.mxu0 }
  0xf3   :  { %v141_v17 = vadd.f32 %v151_v12, %v140_v16 }
  0xf4   :  { %v188_v18 = vpop.f32.mrf.mxu0 }
  0xf5   :  { %145 = vst [vmem:[%s270_s3 + $0x8] sm:$0xff] %v141_v17 }
  0xf6   :  { %150 = vsyncpa [#allocation3], 1 }

</bundles_post_ra>
